<compile_context>
chip_gen: v7x
topology: tpu7x:2x2x1
jax: 0.10.0
libtpu: 0.0.40
codegen_flags: <defaults>
</compile_context>

<pallas_src>
import jax
import jax.numpy as jnp
from jax import lax
from jax.experimental import pallas as pl
from jax.experimental.pallas import tpu as pltpu

LANE = 128
# Explicit scoped-VMEM request: raises v5e's 16 MiB default, equals v6e/v7x's
# 32 MiB default and stays well inside v7x's 64 MiB physical VMEM.
VMEM_LIMIT = 32 * 1024 * 1024


def _rup(n, m):
    return ((n + m - 1) // m) * m


def _pad2(a, rows, cols, dtype=jnp.float32):
    a = jnp.asarray(a, jnp.float32)
    out = jnp.zeros((rows, cols), jnp.float32)
    out = out.at[: a.shape[0], : a.shape[1]].set(a)
    return out.astype(dtype)


def _stack_layers(layers):
    """Pack per-layer (W, b) into stacked (L,128,128) bf16 / (L,1,128) f32."""
    if not layers:
        return (jnp.zeros((1, LANE, LANE), jnp.bfloat16),
                jnp.zeros((1, 1, LANE), jnp.float32))
    ws = jnp.stack([_pad2(w, LANE, LANE, jnp.bfloat16) for (w, _) in layers])
    bs = jnp.stack([_pad2(b, 1, LANE, jnp.float32) for (_, b) in layers])
    return ws, bs


def _full_spec(shape):
    nd = len(shape)
    return pl.BlockSpec(shape, lambda i, _nd=nd: (0,) * _nd)


# ----------------------------- kernels -----------------------------

def _build_node_kernel(n_conv):
    """Node branch, run once: GCNConv stack + endpoint pre-projection.

    Refs:
      a_ref   (Np, Np)   bf16  normalized adjacency
      x_ref   (Np, 128)  bf16  node features (lane-padded)
      cw_ref  (Lc,128,128) bf16 / cb_ref (Lc,1,128) f32   GCNConv weights
      w1s_ref, w1d_ref (128,128) bf16   src/dst row-blocks of head layer 0
      hs_ref, hd_ref   (Np,128) f32     outputs: h@W1s, h@W1d
    """
    def kernel(a_ref, x_ref, cw_ref, cb_ref, w1s_ref, w1d_ref, hs_ref, hd_ref):
        a = a_ref[...]                       # loaded once, reused by every conv
        h = x_ref[...]
        for l in range(n_conv):
            hw = jnp.dot(h, cw_ref[l], preferred_element_type=jnp.float32)
            agg = jnp.dot(a, hw.astype(jnp.bfloat16),
                          preferred_element_type=jnp.float32)
            h = jnp.maximum(agg + cb_ref[l], 0.0).astype(jnp.bfloat16)
        hs_ref[...] = jnp.dot(h, w1s_ref[...], preferred_element_type=jnp.float32)
        hd_ref[...] = jnp.dot(h, w1d_ref[...], preferred_element_type=jnp.float32)
    return kernel


def _build_edge_kernel(n_edge_fc, relu0, relu_rest, te):
    """Edge-tiled branch: index gather + edge-FC + head layers.

    Refs (scalar prefetch first):
      src_ref, dst_ref  (Ep,) i32 SMEM
      hs_ref, hd_ref    (Np,128) f32  (VMEM-resident, constant index_map)
      e_ref             (TE,128) bf16 edge-feature tile
      ew_ref (Le,128,128) bf16 / eb_ref (Le,1,128) f32   edge-FC weights
      w1e_ref (128,128) bf16 / b1_ref (1,128) f32        head layer 0 edge block
      hw_ref (Lh,128,128) bf16 / hb_ref (Lh,1,128) f32   remaining head layers
      out_ref           (TE,128) f32
      gath_ref          (TE,128) f32 scratch (gathered hs[src]+hd[dst])
    """
    n_rest = len(relu_rest)

    def kernel(src_ref, dst_ref, hs_ref, hd_ref, e_ref, ew_ref, eb_ref,
               w1e_ref, b1_ref, hw_ref, hb_ref, out_ref, gath_ref):
        base = pl.program_id(0) * te

        # Endpoint gather from VMEM-resident tables via dynamic row slices.
        # TODO(synk): replace the per-row loop with a vectorized sublane gather
        # (jnp.take / tpu dynamic_gather) for large edge tiles.
        def gather_body(r, carry):
            si = src_ref[base + r]
            di = dst_ref[base + r]
            gath_ref[pl.ds(r, 1), :] = (hs_ref[pl.ds(si, 1), :]
                                        + hd_ref[pl.ds(di, 1), :])
            return carry
        lax.fori_loop(0, te, gather_body, 0)

        # Edge-FC stack (Linear + ReLU), bf16 operands, f32 accumulate.
        e = e_ref[...]
        for l in range(n_edge_fc):
            y = jnp.dot(e, ew_ref[l], preferred_element_type=jnp.float32) + eb_ref[l]
            e = jnp.maximum(y, 0.0).astype(jnp.bfloat16)

        # Head layer 0:  hs[src] + hd[dst] + e@W1e + b1   (concat-free).
        y = (gath_ref[...]
             + jnp.dot(e, w1e_ref[...], preferred_element_type=jnp.float32)
             + b1_ref[...])
        if relu0:
            y = jnp.maximum(y, 0.0)

        # Remaining head layers (out_fc[1:] with ReLU, final without).
        for l in range(n_rest):
            y = (jnp.dot(y.astype(jnp.bfloat16), hw_ref[l],
                         preferred_element_type=jnp.float32) + hb_ref[l])
            if relu_rest[l]:
                y = jnp.maximum(y, 0.0)

        out_ref[...] = y            # lane-dense (TE,128) unmasked store
    return kernel


# ----------------------------- glue / wrapper -----------------------------

def gcn_norm_adj(edge_index, num_nodes):
    """Dense D^-1/2 (A + I) D^-1/2 (PyG gcn_norm, message src -> dst)."""
    src, dst = edge_index
    a = jnp.zeros((num_nodes, num_nodes), jnp.float32)
    a = a.at[dst, src].add(1.0)
    a = a + jnp.eye(num_nodes, dtype=jnp.float32)
    deg = a.sum(axis=1)
    dinv = jnp.where(deg > 0, 1.0 / jnp.sqrt(deg), 0.0)
    return dinv[:, None] * a * dinv[None, :]


def parametric_gcn_forward(params, x, edge_index, edge_attr):
    n_nodes = x.shape[0]
    n_edges = edge_attr.shape[0]
    np_ = _rup(n_nodes, 8)
    te = min(256, _rup(n_edges, 8))          # edge tile rows (>=256 for real sizes)
    ep_ = _rup(n_edges, te)
    n_tiles = ep_ // te
    src, dst = edge_index

    node_f = params["node_conv"][-1][0].shape[1] if params["node_conv"] else x.shape[1]

    # TODO(synk): for non-toy graphs, tile the O(N^2) dense A_hat aggregation
    # (node-row tiles 'parallel', K tiles 'arbitrary' + f32 VMEM accumulator)
    # or switch to a scalar-prefetch sparse segment-sum; re-derive VMEM budget
    # for v7x's 64 MiB.
    a_hat = _pad2(gcn_norm_adj(edge_index, n_nodes), np_, np_, jnp.bfloat16)
    x_p = _pad2(x, np_, LANE, jnp.bfloat16)
    e_p = _pad2(edge_attr, ep_, LANE, jnp.bfloat16)

    # Scalar-prefetch index arrays (padded entries point at node 0, harmless).
    src_pad = jnp.zeros((ep_,), jnp.int32).at[:n_edges].set(src.astype(jnp.int32))
    dst_pad = jnp.zeros((ep_,), jnp.int32).at[:n_edges].set(dst.astype(jnp.int32))

    cw, cb = _stack_layers(params["node_conv"])
    ew, eb = _stack_layers(params["edge_fc"])

    head = list(params["out_fc"]) + [params["final"]]
    w1, b1 = head[0]
    # Split head layer 0 into [src-rows | dst-rows | edge-rows] (concat order).
    w1s = _pad2(w1[:node_f], LANE, LANE, jnp.bfloat16)
    w1d = _pad2(w1[node_f:2 * node_f], LANE, LANE, jnp.bfloat16)
    w1e = _pad2(w1[2 * node_f:], LANE, LANE, jnp.bfloat16)
    b1p = _pad2(b1, 1, LANE, jnp.float32)
    relu0 = len(params["out_fc"]) > 0
    rest = head[1:]
    relu_rest = tuple([True] * (len(rest) - 1) + [False]) if rest else ()
    hw, hb = _stack_layers(rest)

    # ---- node kernel: run once ----
    node_kernel = _build_node_kernel(len(params["node_conv"]))
    hs, hd = pl.pallas_call(
        node_kernel,
        out_shape=(jax.ShapeDtypeStruct((np_, LANE), jnp.float32),
                   jax.ShapeDtypeStruct((np_, LANE), jnp.float32)),
        grid=(1,),
        in_specs=[_full_spec(a_hat.shape), _full_spec(x_p.shape),
                  _full_spec(cw.shape), _full_spec(cb.shape),
                  _full_spec(w1s.shape), _full_spec(w1d.shape)],
        out_specs=(_full_spec((np_, LANE)), _full_spec((np_, LANE))),
        compiler_params=pltpu.CompilerParams(
            dimension_semantics=("arbitrary",),
            vmem_limit_bytes=VMEM_LIMIT),
    )(a_hat, x_p, cw, cb, w1s, w1d)

    # ---- edge kernel: edge-tiled 'parallel' grid with scalar-prefetch gather ----
    edge_kernel = _build_edge_kernel(len(params["edge_fc"]), relu0, relu_rest, te)
    grid_spec = pltpu.PrefetchScalarGridSpec(
        num_scalar_prefetch=2,
        grid=(n_tiles,),
        in_specs=[
            pl.BlockSpec((np_, LANE), lambda i, s, d: (0, 0)),        # hs (resident)
            pl.BlockSpec((np_, LANE), lambda i, s, d: (0, 0)),        # hd (resident)
            pl.BlockSpec((te, LANE), lambda i, s, d: (i, 0)),         # e tile
            pl.BlockSpec(ew.shape, lambda i, s, d: (0, 0, 0)),        # edge-FC W stack
            pl.BlockSpec(eb.shape, lambda i, s, d: (0, 0, 0)),        # edge-FC b stack
            pl.BlockSpec((LANE, LANE), lambda i, s, d: (0, 0)),       # W1e
            pl.BlockSpec((1, LANE), lambda i, s, d: (0, 0)),          # b1
            pl.BlockSpec(hw.shape, lambda i, s, d: (0, 0, 0)),        # head W stack
            pl.BlockSpec(hb.shape, lambda i, s, d: (0, 0, 0)),        # head b stack
        ],
        out_specs=pl.BlockSpec((te, LANE), lambda i, s, d: (i, 0)),
        scratch_shapes=[pltpu.VMEM((te, LANE), jnp.float32)],
    )
    out_p = pl.pallas_call(
        edge_kernel,
        out_shape=jax.ShapeDtypeStruct((ep_, LANE), jnp.float32),
        grid_spec=grid_spec,
        compiler_params=pltpu.CompilerParams(
            dimension_semantics=("parallel",),
            vmem_limit_bytes=VMEM_LIMIT),
    )(src_pad, dst_pad, hs, hd, e_p, ew, eb, w1e, b1p, hw, hb)

    out_dim = params["final"][0].shape[1]
    return out_p[:n_edges, :out_dim]


# ----------------------------- params / reference -----------------------------

def init_params(key, in_node_dim, in_edge_dim, out_dim,
                node_conv_layer_list=(16, 8), edge_fc_layer_list=(8,),
                out_fc_layer_list=(8,)):
    params = {"node_conv": [], "edge_fc": [], "out_fc": []}
    ks = iter(jax.random.split(key, 32))

    c = in_node_dim
    for dim in node_conv_layer_list:
        w = jax.random.normal(next(ks), (c, dim), jnp.float32) * 0.2
        b = jax.random.normal(next(ks), (1, dim), jnp.float32) * 0.1
        params["node_conv"].append((w, b))
        c = dim

    c = in_edge_dim
    for dim in edge_fc_layer_list:
        w = jax.random.normal(next(ks), (c, dim), jnp.float32) * 0.2
        b = jax.random.normal(next(ks), (1, dim), jnp.float32) * 0.1
        params["edge_fc"].append((w, b))
        c = dim

    c = node_conv_layer_list[-1] * 2 + edge_fc_layer_list[-1]
    for dim in out_fc_layer_list:
        w = jax.random.normal(next(ks), (c, dim), jnp.float32) * 0.2
        b = jax.random.normal(next(ks), (1, dim), jnp.float32) * 0.1
        params["out_fc"].append((w, b))
        c = dim

    w = jax.random.normal(next(ks), (c, out_dim), jnp.float32) * 0.2
    b = jax.random.normal(next(ks), (1, out_dim), jnp.float32) * 0.1
    params["final"] = (w, b)
    return params


def parametric_gcn_reference(params, x, edge_index, edge_attr):
    """Pure-JAX f32 reference (same math, no Pallas) for correctness check."""
    a_hat = gcn_norm_adj(edge_index, x.shape[0])
    h = x
    for (w, b) in params["node_conv"]:
        h = jnp.maximum(a_hat @ (h @ w) + b, 0.0)
    e = edge_attr
    for (w, b) in params["edge_fc"]:
        e = jnp.maximum(e @ w + b, 0.0)
    src, dst = edge_index
    feats = jnp.concatenate([h[src], h[dst], e], axis=1)
    for (w, b) in params["out_fc"]:
        feats = jnp.maximum(feats @ w + b, 0.0)
    w, b = params["final"]
    return feats @ w + b


# ----------------------------- main -----------------------------

if __name__ == "__main__":
    key = jax.random.PRNGKey(0)
    k_x, k_src, k_dst, k_ea, k_p = jax.random.split(key, 5)

    N, E = 16, 32                 # nodes, edges
    in_node_dim, in_edge_dim, out_dim = 8, 6, 4

    x = jax.random.normal(k_x, (N, in_node_dim), jnp.float32)
    src = jax.random.randint(k_src, (E,), 0, N)
    dst = jax.random.randint(k_dst, (E,), 0, N)
    edge_index = jnp.stack([src, dst], axis=0)           # (2, E)
    edge_attr = jax.random.normal(k_ea, (E, in_edge_dim), jnp.float32)

    params = init_params(k_p, in_node_dim, in_edge_dim, out_dim)

    fwd = jax.jit(parametric_gcn_forward)
    out = fwd(params, x, edge_index, edge_attr)
    out = jax.block_until_ready(out)

    ref = parametric_gcn_reference(params, x, edge_index, edge_attr)
    assert out.shape == (E, out_dim), out.shape
    # bf16 operands / f32 accumulation vs pure-f32 reference -> looser tolerance.
    assert jnp.allclose(out, ref, atol=5e-2, rtol=5e-2), "mismatch vs reference"

    print("KERNEL_OK")
</pallas_src>

<mosaic_0001>
module attributes {stable_mosaic.version = 11 : i64} {
  func.func private @main(%arg0: i32) attributes {dimension_semantics = [#tpu.dimension_semantics<core_parallel>], iteration_bounds = array<i64: 2>, tpu.core_type = #tpu.core_type<sc_scalar_subcore>, window_params = []} {
    return
  }
}

module attributes {stable_mosaic.version = 11 : i64} {
  func.func private @main(%arg0: i32) attributes {dimension_semantics = [#tpu.dimension_semantics<core_parallel>], iteration_bounds = array<i64: 2>, tpu.core_type = #tpu.core_type<sc_scalar_subcore>, window_params = []} {
    return
  }
}

module attributes {stable_mosaic.version = 11 : i64} {
  func.func @kernel(%arg0: i32, %arg1: memref<16x16xbf16, #tpu.memory_space<vmem>>, %arg2: memref<16x128xbf16, #tpu.memory_space<vmem>>, %arg3: memref<2x128x128xbf16, #tpu.memory_space<vmem>>, %arg4: memref<2x1x128xf32, #tpu.memory_space<vmem>>, %arg5: memref<128x128xbf16, #tpu.memory_space<vmem>>, %arg6: memref<128x128xbf16, #tpu.memory_space<vmem>>, %arg7: memref<16x128xf32, #tpu.memory_space<vmem>>, %arg8: memref<16x128xf32, #tpu.memory_space<vmem>>) attributes {dimension_semantics = [#tpu.dimension_semantics<arbitrary>], iteration_bounds = array<i64: 1>, scalar_prefetch = 0 : i64, scratch_operands = 0 : i64, tpu.core_type = #tpu.core_type<tc>, window_params = [{pipeline_mode = #tpu.pipeline_mode<synchronous>, transform_indices = @transform_0, window_bounds = array<i64: 16, 16>}, {pipeline_mode = #tpu.pipeline_mode<synchronous>, transform_indices = @transform_1, window_bounds = array<i64: 16, 128>}, {pipeline_mode = #tpu.pipeline_mode<synchronous>, transform_indices = @transform_2, window_bounds = array<i64: 2, 128, 128>}, {pipeline_mode = #tpu.pipeline_mode<synchronous>, transform_indices = @transform_3, window_bounds = array<i64: 2, 1, 128>}, {pipeline_mode = #tpu.pipeline_mode<synchronous>, transform_indices = @transform_4, window_bounds = array<i64: 128, 128>}, {pipeline_mode = #tpu.pipeline_mode<synchronous>, transform_indices = @transform_5, window_bounds = array<i64: 128, 128>}, {pipeline_mode = #tpu.pipeline_mode<synchronous>, transform_indices = @transform_6, window_bounds = array<i64: 16, 128>}, {pipeline_mode = #tpu.pipeline_mode<synchronous>, transform_indices = @transform_7, window_bounds = array<i64: 16, 128>}]} {
    %c0 = arith.constant 0 : index
    %c0_0 = arith.constant 0 : index
    %0 = vector.load %arg1[%c0, %c0_0] : memref<16x16xbf16, #tpu.memory_space<vmem>>, vector<16x16xbf16>
    %c0_1 = arith.constant 0 : index
    %c0_2 = arith.constant 0 : index
    %1 = vector.load %arg2[%c0_1, %c0_2] : memref<16x128xbf16, #tpu.memory_space<vmem>>, vector<16x128xbf16>
    %c0_3 = arith.constant 0 : index
    %c0_4 = arith.constant 0 : index
    %c0_5 = arith.constant 0 : index
    %2 = vector.load %arg3[%c0_3, %c0_4, %c0_5] : memref<2x128x128xbf16, #tpu.memory_space<vmem>>, vector<1x128x128xbf16>
    %3 = vector.shape_cast %2 : vector<1x128x128xbf16> to vector<128x128xbf16>
    %cst = arith.constant dense<0.000000e+00> : vector<16x128xf32>
    %4 = tpu.matmul %1, %3, %cst {dimension_numbers = #tpu.dot_dimension_numbers<[1], [0], [0], [1], [0, 0, 1, 1], [], []>} : vector<16x128xbf16>, vector<128x128xbf16>, vector<16x128xf32> -> vector<16x128xf32>
    %5 = arith.truncf %4 : vector<16x128xf32> to vector<16x128xbf16>
    %cst_6 = arith.constant dense<0.000000e+00> : vector<16x128xf32>
    %6 = tpu.matmul %0, %5, %cst_6 {dimension_numbers = #tpu.dot_dimension_numbers<[1], [0], [0], [1], [0, 0, 1, 1], [], []>} : vector<16x16xbf16>, vector<16x128xbf16>, vector<16x128xf32> -> vector<16x128xf32>
    %c0_7 = arith.constant 0 : index
    %c0_8 = arith.constant 0 : index
    %c0_9 = arith.constant 0 : index
    %7 = vector.load %arg4[%c0_7, %c0_8, %c0_9] : memref<2x1x128xf32, #tpu.memory_space<vmem>>, vector<1x1x128xf32>
    %8 = vector.shape_cast %7 : vector<1x1x128xf32> to vector<1x128xf32>
    %9 = vector.broadcast %8 : vector<1x128xf32> to vector<16x128xf32>
    %10 = arith.addf %6, %9 : vector<16x128xf32>
    %cst_10 = arith.constant 0.000000e+00 : f32
    %11 = vector.broadcast %cst_10 : f32 to vector<16x128xf32>
    %12 = arith.maximumf %10, %11 : vector<16x128xf32>
    %13 = arith.truncf %12 : vector<16x128xf32> to vector<16x128xbf16>
    %c1 = arith.constant 1 : index
    %c0_11 = arith.constant 0 : index
    %c0_12 = arith.constant 0 : index
    %14 = vector.load %arg3[%c1, %c0_11, %c0_12] : memref<2x128x128xbf16, #tpu.memory_space<vmem>>, vector<1x128x128xbf16>
    %15 = vector.shape_cast %14 : vector<1x128x128xbf16> to vector<128x128xbf16>
    %cst_13 = arith.constant dense<0.000000e+00> : vector<16x128xf32>
    %16 = tpu.matmul %13, %15, %cst_13 {dimension_numbers = #tpu.dot_dimension_numbers<[1], [0], [0], [1], [0, 0, 1, 1], [], []>} : vector<16x128xbf16>, vector<128x128xbf16>, vector<16x128xf32> -> vector<16x128xf32>
    %17 = arith.truncf %16 : vector<16x128xf32> to vector<16x128xbf16>
    %cst_14 = arith.constant dense<0.000000e+00> : vector<16x128xf32>
    %18 = tpu.matmul %0, %17, %cst_14 {dimension_numbers = #tpu.dot_dimension_numbers<[1], [0], [0], [1], [0, 0, 1, 1], [], []>} : vector<16x16xbf16>, vector<16x128xbf16>, vector<16x128xf32> -> vector<16x128xf32>
    %c1_15 = arith.constant 1 : index
    %c0_16 = arith.constant 0 : index
    %c0_17 = arith.constant 0 : index
    %19 = vector.load %arg4[%c1_15, %c0_16, %c0_17] : memref<2x1x128xf32, #tpu.memory_space<vmem>>, vector<1x1x128xf32>
    %20 = vector.shape_cast %19 : vector<1x1x128xf32> to vector<1x128xf32>
    %21 = vector.broadcast %20 : vector<1x128xf32> to vector<16x128xf32>
    %22 = arith.addf %18, %21 : vector<16x128xf32>
    %cst_18 = arith.constant 0.000000e+00 : f32
    %23 = vector.broadcast %cst_18 : f32 to vector<16x128xf32>
    %24 = arith.maximumf %22, %23 : vector<16x128xf32>
    %25 = arith.truncf %24 : vector<16x128xf32> to vector<16x128xbf16>
    %c0_19 = arith.constant 0 : index
    %c0_20 = arith.constant 0 : index
    %26 = vector.load %arg5[%c0_19, %c0_20] : memref<128x128xbf16, #tpu.memory_space<vmem>>, vector<128x128xbf16>
    %cst_21 = arith.constant dense<0.000000e+00> : vector<16x128xf32>
    %27 = tpu.matmul %25, %26, %cst_21 {dimension_numbers = #tpu.dot_dimension_numbers<[1], [0], [0], [1], [0, 0, 1, 1], [], []>} : vector<16x128xbf16>, vector<128x128xbf16>, vector<16x128xf32> -> vector<16x128xf32>
    %c0_22 = arith.constant 0 : index
    %c0_23 = arith.constant 0 : index
    %28 = vector.load %arg7[%c0_22, %c0_23] : memref<16x128xf32, #tpu.memory_space<vmem>>, vector<16x128xf32>
    tpu.vector_store %arg7[%c0_22, %c0_23], %27 {strides = array<i32>} : memref<16x128xf32, #tpu.memory_space<vmem>>, vector<16x128xf32>,
    %c0_24 = arith.constant 0 : index
    %c0_25 = arith.constant 0 : index
    %29 = vector.load %arg6[%c0_24, %c0_25] : memref<128x128xbf16, #tpu.memory_space<vmem>>, vector<128x128xbf16>
    %cst_26 = arith.constant dense<0.000000e+00> : vector<16x128xf32>
    %30 = tpu.matmul %25, %29, %cst_26 {dimension_numbers = #tpu.dot_dimension_numbers<[1], [0], [0], [1], [0, 0, 1, 1], [], []>} : vector<16x128xbf16>, vector<128x128xbf16>, vector<16x128xf32> -> vector<16x128xf32>
    %c0_27 = arith.constant 0 : index
    %c0_28 = arith.constant 0 : index
    %31 = vector.load %arg8[%c0_27, %c0_28] : memref<16x128xf32, #tpu.memory_space<vmem>>, vector<16x128xf32>
    tpu.vector_store %arg8[%c0_27, %c0_28], %30 {strides = array<i32>} : memref<16x128xf32, #tpu.memory_space<vmem>>, vector<16x128xf32>,
    return
  }
  func.func @transform_0(%arg0: i32) -> (i32, i32) {
    %c0_i32 = arith.constant 0 : i32
    %c0_i32_0 = arith.constant 0 : i32
    %c0_i32_1 = arith.constant 0 : i32
    return %c0_i32, %c0_i32_0 : i32, i32
  }
  func.func @transform_1(%arg0: i32) -> (i32, i32) {
    %c0_i32 = arith.constant 0 : i32
    %c0_i32_0 = arith.constant 0 : i32
    %c0_i32_1 = arith.constant 0 : i32
    return %c0_i32, %c0_i32_0 : i32, i32
  }
  func.func @transform_2(%arg0: i32) -> (i32, i32, i32) {
    %c0_i32 = arith.constant 0 : i32
    %c0_i32_0 = arith.constant 0 : i32
    %c0_i32_1 = arith.constant 0 : i32
    %c0_i32_2 = arith.constant 0 : i32
    return %c0_i32, %c0_i32_0, %c0_i32_1 : i32, i32, i32
  }
  func.func @transform_3(%arg0: i32) -> (i32, i32, i32) {
    %c0_i32 = arith.constant 0 : i32
    %c0_i32_0 = arith.constant 0 : i32
    %c0_i32_1 = arith.constant 0 : i32
    %c0_i32_2 = arith.constant 0 : i32
    return %c0_i32, %c0_i32_0, %c0_i32_1 : i32, i32, i32
  }
  func.func @transform_4(%arg0: i32) -> (i32, i32) {
    %c0_i32 = arith.constant 0 : i32
    %c0_i32_0 = arith.constant 0 : i32
    %c0_i32_1 = arith.constant 0 : i32
    return %c0_i32, %c0_i32_0 : i32, i32
  }
  func.func @transform_5(%arg0: i32) -> (i32, i32) {
    %c0_i32 = arith.constant 0 : i32
    %c0_i32_0 = arith.constant 0 : i32
    %c0_i32_1 = arith.constant 0 : i32
    return %c0_i32, %c0_i32_0 : i32, i32
  }
  func.func @transform_6(%arg0: i32) -> (i32, i32) {
    %c0_i32 = arith.constant 0 : i32
    %c0_i32_0 = arith.constant 0 : i32
    %c0_i32_1 = arith.constant 0 : i32
    return %c0_i32, %c0_i32_0 : i32, i32
  }
  func.func @transform_7(%arg0: i32) -> (i32, i32) {
    %c0_i32 = arith.constant 0 : i32
    %c0_i32_0 = arith.constant 0 : i32
    %c0_i32_1 = arith.constant 0 : i32
    return %c0_i32, %c0_i32_0 : i32, i32
  }
}

module attributes {stable_mosaic.version = 11 : i64} {
  func.func @kernel(%arg0: i32, %arg1: memref<32xi32, #tpu.memory_space<smem>>, %arg2: memref<32xi32, #tpu.memory_space<smem>>, %arg3: memref<16x128xf32, #tpu.memory_space<vmem>>, %arg4: memref<16x128xf32, #tpu.memory_space<vmem>>, %arg5: memref<32x128xbf16, #tpu.memory_space<vmem>>, %arg6: memref<1x128x128xbf16, #tpu.memory_space<vmem>>, %arg7: memref<1x1x128xf32, #tpu.memory_space<vmem>>, %arg8: memref<128x128xbf16, #tpu.memory_space<vmem>>, %arg9: memref<1x128xf32, #tpu.memory_space<vmem>>, %arg10: memref<1x128x128xbf16, #tpu.memory_space<vmem>>, %arg11: memref<1x1x128xf32, #tpu.memory_space<vmem>>, %arg12: memref<32x128xf32, #tpu.memory_space<vmem>>, %arg13: memref<32x128xf32, #tpu.memory_space<vmem>>) attributes {dimension_semantics = [#tpu.dimension_semantics<parallel>], iteration_bounds = array<i64: 1>, scalar_prefetch = 2 : i64, scratch_operands = 1 : i64, tpu.core_type = #tpu.core_type<tc>, window_params = [{pipeline_mode = #tpu.pipeline_mode<synchronous>, transform_indices = @transform_0, window_bounds = array<i64: 16, 128>}, {pipeline_mode = #tpu.pipeline_mode<synchronous>, transform_indices = @transform_1, window_bounds = array<i64: 16, 128>}, {transform_indices = @transform_2, window_bounds = array<i64: 32, 128>}, {pipeline_mode = #tpu.pipeline_mode<synchronous>, transform_indices = @transform_3, window_bounds = array<i64: 1, 128, 128>}, {pipeline_mode = #tpu.pipeline_mode<synchronous>, transform_indices = @transform_4, window_bounds = array<i64: 1, 1, 128>}, {pipeline_mode = #tpu.pipeline_mode<synchronous>, transform_indices = @transform_5, window_bounds = array<i64: 128, 128>}, {pipeline_mode = #tpu.pipeline_mode<synchronous>, transform_indices = @transform_6, window_bounds = array<i64: 1, 128>}, {pipeline_mode = #tpu.pipeline_mode<synchronous>, transform_indices = @transform_7, window_bounds = array<i64: 1, 128, 128>}, {pipeline_mode = #tpu.pipeline_mode<synchronous>, transform_indices = @transform_8, window_bounds = array<i64: 1, 1, 128>}, {transform_indices = @transform_9, window_bounds = array<i64: 32, 128>}]} {
    %c32_i32 = arith.constant 32 : i32
    %0 = arith.muli %arg0, %c32_i32 : i32
    %c0_i32 = arith.constant 0 : i32
    %c32_i32_0 = arith.constant 32 : i32
    %1 = arith.addi %c0_i32, %c32_i32_0 : i32
    %c1_i32 = arith.constant 1 : i32
    scf.for %arg14 = %c0_i32 to %1 step %c1_i32  : i32 {
      %31 = arith.addi %0, %arg14 : i32
      %32 = arith.index_cast %31 : i32 to index
      %33 = memref.load %arg1[%32] : memref<32xi32, #tpu.memory_space<smem>>
      %34 = arith.addi %0, %arg14 : i32
      %35 = arith.index_cast %34 : i32 to index
      %36 = memref.load %arg2[%35] : memref<32xi32, #tpu.memory_space<smem>>
      %37 = arith.index_cast %33 : i32 to index
      %c0_27 = arith.constant 0 : index
      %38 = vector.load %arg3[%37, %c0_27] : memref<16x128xf32, #tpu.memory_space<vmem>>, vector<1x128xf32>
      %39 = arith.index_cast %36 : i32 to index
      %c0_28 = arith.constant 0 : index
      %40 = vector.load %arg4[%39, %c0_28] : memref<16x128xf32, #tpu.memory_space<vmem>>, vector<1x128xf32>
      %41 = arith.addf %38, %40 : vector<1x128xf32>
      %42 = arith.index_cast %arg14 : i32 to index
      %c0_29 = arith.constant 0 : index
      %43 = vector.load %arg13[%42, %c0_29] : memref<32x128xf32, #tpu.memory_space<vmem>>, vector<1x128xf32>
      tpu.vector_store %arg13[%42, %c0_29], %41 {strides = array<i32>} : memref<32x128xf32, #tpu.memory_space<vmem>>, vector<1x128xf32>,
    }
    %c32_i32_1 = arith.constant 32 : i32
    %c0 = arith.constant 0 : index
    %c0_2 = arith.constant 0 : index
    %2 = vector.load %arg5[%c0, %c0_2] : memref<32x128xbf16, #tpu.memory_space<vmem>>, vector<32x128xbf16>
    %c0_3 = arith.constant 0 : index
    %c0_4 = arith.constant 0 : index
    %c0_5 = arith.constant 0 : index
    %3 = vector.load %arg6[%c0_3, %c0_4, %c0_5] : memref<1x128x128xbf16, #tpu.memory_space<vmem>>, vector<1x128x128xbf16>
    %4 = vector.shape_cast %3 : vector<1x128x128xbf16> to vector<128x128xbf16>
    %cst = arith.constant dense<0.000000e+00> : vector<32x128xf32>
    %5 = tpu.matmul %2, %4, %cst {dimension_numbers = #tpu.dot_dimension_numbers<[1], [0], [0], [1], [0, 0, 1, 1], [], []>} : vector<32x128xbf16>, vector<128x128xbf16>, vector<32x128xf32> -> vector<32x128xf32>
    %c0_6 = arith.constant 0 : index
    %c0_7 = arith.constant 0 : index
    %c0_8 = arith.constant 0 : index
    %6 = vector.load %arg7[%c0_6, %c0_7, %c0_8] : memref<1x1x128xf32, #tpu.memory_space<vmem>>, vector<1x1x128xf32>
    %7 = vector.shape_cast %6 : vector<1x1x128xf32> to vector<1x128xf32>
    %8 = vector.broadcast %7 : vector<1x128xf32> to vector<32x128xf32>
    %9 = arith.addf %5, %8 : vector<32x128xf32>
    %cst_9 = arith.constant 0.000000e+00 : f32
    %10 = vector.broadcast %cst_9 : f32 to vector<32x128xf32>
    %11 = arith.maximumf %9, %10 : vector<32x128xf32>
    %12 = arith.truncf %11 : vector<32x128xf32> to vector<32x128xbf16>
    %c0_10 = arith.constant 0 : index
    %c0_11 = arith.constant 0 : index
    %13 = vector.load %arg13[%c0_10, %c0_11] : memref<32x128xf32, #tpu.memory_space<vmem>>, vector<32x128xf32>
    %c0_12 = arith.constant 0 : index
    %c0_13 = arith.constant 0 : index
    %14 = vector.load %arg8[%c0_12, %c0_13] : memref<128x128xbf16, #tpu.memory_space<vmem>>, vector<128x128xbf16>
    %cst_14 = arith.constant dense<0.000000e+00> : vector<32x128xf32>
    %15 = tpu.matmul %12, %14, %cst_14 {dimension_numbers = #tpu.dot_dimension_numbers<[1], [0], [0], [1], [0, 0, 1, 1], [], []>} : vector<32x128xbf16>, vector<128x128xbf16>, vector<32x128xf32> -> vector<32x128xf32>
    %16 = arith.addf %13, %15 : vector<32x128xf32>
    %c0_15 = arith.constant 0 : index
    %c0_16 = arith.constant 0 : index
    %17 = vector.load %arg9[%c0_15, %c0_16] : memref<1x128xf32, #tpu.memory_space<vmem>>, vector<1x128xf32>
    %18 = vector.broadcast %17 : vector<1x128xf32> to vector<32x128xf32>
    %19 = arith.addf %16, %18 : vector<32x128xf32>
    %cst_17 = arith.constant 0.000000e+00 : f32
    %20 = vector.broadcast %cst_17 : f32 to vector<32x128xf32>
    %21 = arith.maximumf %19, %20 : vector<32x128xf32>
    %22 = arith.truncf %21 : vector<32x128xf32> to vector<32x128xbf16>
    %c0_18 = arith.constant 0 : index
    %c0_19 = arith.constant 0 : index
    %c0_20 = arith.constant 0 : index
    %23 = vector.load %arg10[%c0_18, %c0_19, %c0_20] : memref<1x128x128xbf16, #tpu.memory_space<vmem>>, vector<1x128x128xbf16>
    %24 = vector.shape_cast %23 : vector<1x128x128xbf16> to vector<128x128xbf16>
    %cst_21 = arith.constant dense<0.000000e+00> : vector<32x128xf32>
    %25 = tpu.matmul %22, %24, %cst_21 {dimension_numbers = #tpu.dot_dimension_numbers<[1], [0], [0], [1], [0, 0, 1, 1], [], []>} : vector<32x128xbf16>, vector<128x128xbf16>, vector<32x128xf32> -> vector<32x128xf32>
    %c0_22 = arith.constant 0 : index
    %c0_23 = arith.constant 0 : index
    %c0_24 = arith.constant 0 : index
    %26 = vector.load %arg11[%c0_22, %c0_23, %c0_24] : memref<1x1x128xf32, #tpu.memory_space<vmem>>, vector<1x1x128xf32>
    %27 = vector.shape_cast %26 : vector<1x1x128xf32> to vector<1x128xf32>
    %28 = vector.broadcast %27 : vector<1x128xf32> to vector<32x128xf32>
    %29 = arith.addf %25, %28 : vector<32x128xf32>
    %c0_25 = arith.constant 0 : index
    %c0_26 = arith.constant 0 : index
    %30 = vector.load %arg12[%c0_25, %c0_26] : memref<32x128xf32, #tpu.memory_space<vmem>>, vector<32x128xf32>
    tpu.vector_store %arg12[%c0_25, %c0_26], %29 {strides = array<i32>} : memref<32x128xf32, #tpu.memory_space<vmem>>, vector<32x128xf32>,
    return
  }
  func.func @transform_0(%arg0: i32, %arg1: memref<32xi32, #tpu.memory_space<smem>>, %arg2: memref<32xi32, #tpu.memory_space<smem>>) -> (i32, i32) {
    %c0_i32 = arith.constant 0 : i32
    %c0_i32_0 = arith.constant 0 : i32
    %c0_i32_1 = arith.constant 0 : i32
    return %c0_i32, %c0_i32_0 : i32, i32
  }
  func.func @transform_1(%arg0: i32, %arg1: memref<32xi32, #tpu.memory_space<smem>>, %arg2: memref<32xi32, #tpu.memory_space<smem>>) -> (i32, i32) {
    %c0_i32 = arith.constant 0 : i32
    %c0_i32_0 = arith.constant 0 : i32
    %c0_i32_1 = arith.constant 0 : i32
    return %c0_i32, %c0_i32_0 : i32, i32
  }
  func.func @transform_2(%arg0: i32, %arg1: memref<32xi32, #tpu.memory_space<smem>>, %arg2: memref<32xi32, #tpu.memory_space<smem>>) -> (i32, i32) {
    %c0_i32 = arith.constant 0 : i32
    %c0_i32_0 = arith.constant 0 : i32
    return %arg0, %c0_i32 : i32, i32
  }
  func.func @transform_3(%arg0: i32, %arg1: memref<32xi32, #tpu.memory_space<smem>>, %arg2: memref<32xi32, #tpu.memory_space<smem>>) -> (i32, i32, i32) {
    %c0_i32 = arith.constant 0 : i32
    %c0_i32_0 = arith.constant 0 : i32
    %c0_i32_1 = arith.constant 0 : i32
    %c0_i32_2 = arith.constant 0 : i32
    return %c0_i32, %c0_i32_0, %c0_i32_1 : i32, i32, i32
  }
  func.func @transform_4(%arg0: i32, %arg1: memref<32xi32, #tpu.memory_space<smem>>, %arg2: memref<32xi32, #tpu.memory_space<smem>>) -> (i32, i32, i32) {
    %c0_i32 = arith.constant 0 : i32
    %c0_i32_0 = arith.constant 0 : i32
    %c0_i32_1 = arith.constant 0 : i32
    %c0_i32_2 = arith.constant 0 : i32
    return %c0_i32, %c0_i32_0, %c0_i32_1 : i32, i32, i32
  }
  func.func @transform_5(%arg0: i32, %arg1: memref<32xi32, #tpu.memory_space<smem>>, %arg2: memref<32xi32, #tpu.memory_space<smem>>) -> (i32, i32) {
    %c0_i32 = arith.constant 0 : i32
    %c0_i32_0 = arith.constant 0 : i32
    %c0_i32_1 = arith.constant 0 : i32
    return %c0_i32, %c0_i32_0 : i32, i32
  }
  func.func @transform_6(%arg0: i32, %arg1: memref<32xi32, #tpu.memory_space<smem>>, %arg2: memref<32xi32, #tpu.memory_space<smem>>) -> (i32, i32) {
    %c0_i32 = arith.constant 0 : i32
    %c0_i32_0 = arith.constant 0 : i32
    %c0_i32_1 = arith.constant 0 : i32
    return %c0_i32, %c0_i32_0 : i32, i32
  }
  func.func @transform_7(%arg0: i32, %arg1: memref<32xi32, #tpu.memory_space<smem>>, %arg2: memref<32xi32, #tpu.memory_space<smem>>) -> (i32, i32, i32) {
    %c0_i32 = arith.constant 0 : i32
    %c0_i32_0 = arith.constant 0 : i32
    %c0_i32_1 = arith.constant 0 : i32
    %c0_i32_2 = arith.constant 0 : i32
    return %c0_i32, %c0_i32_0, %c0_i32_1 : i32, i32, i32
  }
  func.func @transform_8(%arg0: i32, %arg1: memref<32xi32, #tpu.memory_space<smem>>, %arg2: memref<32xi32, #tpu.memory_space<smem>>) -> (i32, i32, i32) {
    %c0_i32 = arith.constant 0 : i32
    %c0_i32_0 = arith.constant 0 : i32
    %c0_i32_1 = arith.constant 0 : i32
    %c0_i32_2 = arith.constant 0 : i32
    return %c0_i32, %c0_i32_0, %c0_i32_1 : i32, i32, i32
  }
  func.func @transform_9(%arg0: i32, %arg1: memref<32xi32, #tpu.memory_space<smem>>, %arg2: memref<32xi32, #tpu.memory_space<smem>>) -> (i32, i32) {
    %c0_i32 = arith.constant 0 : i32
    %c0_i32_0 = arith.constant 0 : i32
    return %arg0, %c0_i32 : i32, i32
  }
}

</mosaic_0001>

<bundles_post_ra>
// kernel: parametric_gcn_forward.3
= control target key start
LH: loop header
LB: loop body
LE: loop exit
PB: predicated region body
PF: predicated region fallthrough
CT: control target
= control target key end

     0   :  { %s840_s0 = inlined_call_operand.vmem [shape: s32[32], index: 0, kind: input, shape index: {}]   ;;  %s841_s2 = inlined_call_operand.vmem [shape: f32[16,128], index: 2, kind: input, shape index: {}]   ;;  %s842_s3 = inlined_call_operand.vmem [shape: f32[16,128], index: 3, kind: input, shape index: {}]   ;;  %s843_s4 = inlined_call_operand.vmem [shape: bf16[32,128], index: 4, kind: input, shape index: {}]   ;;  %s844_s5 = inlined_call_operand.vmem [shape: bf16[1,128,128], index: 5, kind: input, shape index: {}]   ;;  %s845_s6 = inlined_call_operand.vmem [shape: f32[1,1,128], index: 6, kind: input, shape index: {}]   ;;  %s846_s7 = inlined_call_operand.vmem [shape: bf16[128,128], index: 7, kind: input, shape index: {}]   ;;  %s847_s8 = inlined_call_operand.vmem [shape: f32[1,128], index: 8, kind: input, shape index: {}]   ;;  %s848_s9 = inlined_call_operand.vmem [shape: bf16[1,128,128], index: 9, kind: input, shape index: {}]   ;;  %s849_s10 = inlined_call_operand.vmem [shape: f32[1,1,128], index: 10, kind: input, shape index: {}]   ;;  %s850_s11 = inlined_call_operand.vmem [shape: f32[32,128], index: 11, kind: output, shape index: {}]   ;;  %s851_s1 = inlined_call_operand.vmem [shape: s32[32], index: 1, kind: input, shape index: {}]  }
   0x1   :  { %s16_s19 = sshll.u32 %s840_s0, 4  ;;  %s20_s22 = sshll.u32 %s851_s1, 4  ;;  %s17_s19 = int_to_ptr.vmem [resolvable:$true] %s16_s19  ;;  %s21_s22 = int_to_ptr.vmem [resolvable:$true] %s20_s22 }
   0x2   :  { %s633_s23 = scalar_lea.vmem %s17_s19, 16  ;;  %p638_p1 = scmp.lt.s32.totalorder %s17_s19, %s17_s19 }
   0x3   :  { %p634_p0 = scmp.ne.s32.totalorder %s17_s19, %s633_s23  ;;  %p639_p2 = scmp.lt.s32.totalorder %s633_s23, %s633_s23 }
   0x5   :  { %p640_p3 = por %p639_p2, %p638_p1 }
   0x7   :  { %p641_p4 = pnand %p640_p3, %p634_p0 }
   0x9   :  { %644 = shalt.err (!%p641_p4)  }
   0xa   :  { %s667_s24 = smov [#allocation4]   ;;  %s645_s25 = scalar_lea.vmem %s21_s22, 16 }
   0xb   :  { %19 = dma.vmem_to_smem %s17_s19, 16, %s667_s24, [#allocation3] }
   0xc   :  { %p646_p5 = scmp.ne.s32.totalorder %s21_s22, %s645_s25  ;;  %p650_p6 = scmp.lt.s32.totalorder %s21_s22, %s21_s22 }
   0xd   :  { %p651_p7 = scmp.lt.s32.totalorder %s645_s25, %s645_s25 }
   0xf   :  { %p652_p8 = por %p651_p7, %p650_p6 }
  0x11   :  { %p653_p9 = pnand %p652_p8, %p646_p5 }
  0x13   :  { %656 = shalt.err (!%p653_p9)  }
  0x14   :  { %s668_s0 = smov [#allocation5]  }
  0x15   :  { %23 = dma.vmem_to_smem %s21_s22, 16, %s668_s0, [#allocation3] }
  0x16   :  { %661 = dma.done.wait [#allocation3], 32 }
  0x17   :  { %662 = vsyncadd [#allocation3], 4294967264 }
  0x18   :  { %25 = sfence }
  0x19   :  { %s663_s1 = smov 0  }
  0x1a LB: > { %s53_s26 = sld [smem:[#allocation4 + %s665_s1]]  ;;  %s60_s15 = scalar_lea.vmem [#allocation2], %s665_s1  ;;  %s665_s1 = sphi %s663_s1, %s51_s1  }
  0x1b   : > { %s54_s27 = sld [smem:[#allocation5 + %s665_s1]]  ;;  %s51_s1 = sadd.s32 1, %s665_s1  }
  0x1c   : > { %p48_p10 = scmp.ge.s32.totalorder %s51_s1, 32  }
  0x1d   :  { %v607_v3 = vld [vmem:[%s844_s5] sm:$0xff] (%p48_p10)   ;;  %v608_v4 = vld [vmem:[%s844_s5 + $0x8] sm:$0xff] (%p48_p10)   ;;  %v609_v5 = vld [vmem:[%s844_s5 + $0x10] sm:$0xff] (%p48_p10)  }
  0x1e   :  { %537 = vmatprep.subr.bf16.mxu0 (%p48_p10), %v607_v3  ;;  %v610_v6 = vld [vmem:[%s844_s5 + $0x18] sm:$0xff] (%p48_p10)   ;;  %v615_v7 = vld [vmem:[%s843_s4] sm:$0xff] (%p48_p10)   ;;  %v618_v9 = vld [vmem:[%s846_s7 + $0x8] sm:$0xff] (%p48_p10)  }
  0x1f   :  { %50 = sbr.rel (!%p48_p10) target bundleno = 26 (0x1a), region = 66  ;;  %538 = vmatpush3.bf16.msra.mxu0 (%p48_p10), %v607_v3  ;;  %553 = vmatprep.mubr.bf16.mxu0 (%p48_p10), %v615_v7  ;;  %v617_v8 = vld [vmem:[%s846_s7] sm:$0xff] (%p48_p10)   ;;  %v619_v11 = vld [vmem:[%s846_s7 + $0x10] sm:$0xff] (%p48_p10)   ;;  %v612_v12 = vld [vmem:[%s844_s5 + $0x28] sm:$0xff] (%p48_p10)  }
  0x20   : > { %s55_s30 = scalar_lea.vmem %s841_s2, %s53_s26  ;;  %539 = vmatprep.subr.bf16.mxu0 (%p48_p10), %v608_v4  ;;  %v611_v10 = vld [vmem:[%s844_s5 + $0x20] sm:$0xff] (%p48_p10)   ;;  %557 = vmatprep.subr.bf16.mxu1 (%p48_p10), %v617_v8  ;;  %v620_v13 = vld [vmem:[%s846_s7 + $0x18] sm:$0xff] (%p48_p10)   ;;  %v613_v14 = vld [vmem:[%s844_s5 + $0x30] sm:$0xff] (%p48_p10)  }
  0x21   : > { %s57_s14 = scalar_lea.vmem %s842_s3, %s54_s27  ;;  %v56_v0 = vld [vmem:[%s55_s30] sm:$0x1]  ;;  %558 = vmatpush3.bf16.msra.mxu1 (%p48_p10), %v617_v8  ;;  %v614_v16 = vld [vmem:[%s844_s5 + $0x38] sm:$0xff] (%p48_p10)   ;;  %v622_v17 = vld [vmem:[%s846_s7 + $0x28] sm:$0xff] (%p48_p10)  }
  0x22   : > { %v58_v1 = vld [vmem:[%s57_s14] sm:$0x1]  ;;  %559 = vmatprep.subr.bf16.mxu1 (%p48_p10), %v618_v9  ;;  %v616_v18 = vld [vmem:[%s843_s4 + $0x8] sm:$0xff] (%p48_p10)   ;;  %v623_v19 = vld [vmem:[%s846_s7 + $0x30] sm:$0xff] (%p48_p10)  }
  0x23   : > { %v59_v2 = vadd.f32 %v58_v1, %v56_v0  ;;  %540 = vmatpush3.bf16.msra.mxu0 (%p48_p10), %v608_v4  ;;  %v621_v15 = vld [vmem:[%s846_s7 + $0x20] sm:$0xff] (%p48_p10)   ;;  %v624_v20 = vld [vmem:[%s846_s7 + $0x38] sm:$0xff] (%p48_p10)   ;;  %v626_v22 = vld [vmem:[%s848_s9 + $0x8] sm:$0xff] (%p48_p10)  }
  0x24   :  { %541 = vmatprep.subr.bf16.mxu0 (%p48_p10), %v609_v5  ;;  %v625_v21 = vld [vmem:[%s848_s9] sm:$0xff] (%p48_p10)   ;;  %v627_v23 = vld [vmem:[%s848_s9 + $0x10] sm:$0xff] (%p48_p10)   ;;  %v628_v24 = vld [vmem:[%s848_s9 + $0x18] sm:$0xff] (%p48_p10)  }
  0x25   : > { %61 = vst [vmem:[%s60_s15] sm:$0x1] %v59_v2  ;;  %560 = vmatpush3.bf16.msra.mxu1 (%p48_p10), %v618_v9  ;;  %v629_v25 = vld [vmem:[%s848_s9 + $0x20] sm:$0xff] (%p48_p10)   ;;  %v630_v41 = vld [vmem:[%s848_s9 + $0x28] sm:$0xff] (%p48_p10)   ;;  %v631_v42 = vld [vmem:[%s848_s9 + $0x30] sm:$0xff] (%p48_p10)  }
  0x26   :  { %561 = vmatprep.subr.bf16.mxu1 %v619_v11  ;;  %v478_v26 = vld [vmem:[%s845_s6] ss:$0 sm:$0xff]  ;;  %v632_v43 = vld [vmem:[%s848_s9 + $0x38] sm:$0xff]  }
  0x27   :  { %542 = vmatpush3.bf16.msra.mxu0 %v609_v5  ;;  %v497_v47 = vld [vmem:[%s847_s8] ss:$0 sm:$0xff] }
  0x28   :  { %543 = vmatprep.subr.bf16.mxu0 %v610_v6  ;;  %v498_v3 = vld [vmem:[%s849_s10] ss:$0 sm:$0xff] }
  0x29   :  { %562 = vmatpush3.bf16.msra.mxu1 %v619_v11 }
  0x2a   :  { %563 = vmatprep.subr.bf16.mxu1 %v620_v13 }
  0x2b   :  { %544 = vmatpush3.bf16.msra.mxu0 %v610_v6 }
  0x2c   :  { %545 = vmatprep.subr.bf16.mxu0 %v611_v10  ;;  %v206_v44 = vld [vmem:[#allocation2 + $0x10] sm:$0xff]  ;;  %v204_v45 = vld [vmem:[#allocation2] sm:$0xff]  ;;  %v207_v48 = vld [vmem:[#allocation2 + $0x18] sm:$0xff] }
  0x2d   :  { %564 = vmatpush3.bf16.msra.mxu1 %v620_v13  ;;  %v205_v51 = vld [vmem:[#allocation2 + $0x8] sm:$0xff] }
  0x2e   :  { %565 = vmatprep.subr.bf16.mxu1 %v621_v15 }
  0x2f   :  { %546 = vmatpush3.bf16.msra.mxu0 %v611_v10 }
  0x30   :  { %547 = vmatprep.subr.bf16.mxu0 %v612_v12 }
  0x31   :  { %566 = vmatpush3.bf16.msra.mxu1 %v621_v15 }
  0x32   :  { %567 = vmatprep.subr.bf16.mxu1 %v622_v17 }
  0x33   :  { %548 = vmatpush3.bf16.msra.mxu0 %v612_v12 }
  0x34   :  { %549 = vmatprep.subr.bf16.mxu0 %v613_v14 }
  0x35   :  { %568 = vmatpush3.bf16.msra.mxu1 %v622_v17 }
  0x36   :  { %569 = vmatprep.subr.bf16.mxu1 %v623_v19 }
  0x37   :  { %550 = vmatpush3.bf16.msra.mxu0 %v613_v14 }
  0x38   :  { %551 = vmatprep.subr.bf16.mxu0 %v614_v16 }
  0x39   :  { %570 = vmatpush3.bf16.msra.mxu1 %v623_v19 }
  0x3a   :  { %571 = vmatprep.subr.bf16.mxu1 %v624_v20 }
  0x3b   :  { %552 = vmatpush3.bf16.msra.mxu0 %v614_v16 }
  0x3c   :  { %577 = vmatprep.subr.bf16.mxu0 %v625_v21 }
  0x3d   :  { %572 = vmatpush3.bf16.msra.mxu1 %v624_v20 }
  0x3e   :  { %554 = vmatmul.mubr.bf16.vlgmr.msra.gmra.mrb[0].mxu0 %v616_v18 }
  0x3f   :  { %578 = vmatpush3.bf16.msra.mxu0 %v625_v21 }
  0x40   :  { %579 = vmatprep.subr.bf16.mxu0 %v626_v22 }
  0x43   :  { %580 = vmatpush3.bf16.msra.mxu0 %v626_v22 }
  0x44   :  { %581 = vmatprep.subr.bf16.mxu0 %v627_v23 }
  0x47   :  { %582 = vmatpush3.bf16.msra.mxu0 %v627_v23 }
  0x48   :  { %583 = vmatprep.subr.bf16.mxu0 %v628_v24 }
  0x4b   :  { %584 = vmatpush3.bf16.msra.mxu0 %v628_v24 }
  0x4c   :  { %585 = vmatprep.subr.bf16.mxu0 %v629_v25 }
  0x4f   :  { %586 = vmatpush3.bf16.msra.mxu0 %v629_v25 }
  0x50   :  { %587 = vmatprep.subr.bf16.mxu0 %v630_v41 }
  0x53   :  { %588 = vmatpush3.bf16.msra.mxu0 %v630_v41 }
  0x54   :  { %589 = vmatprep.subr.bf16.mxu0 %v631_v42 }
  0x57   :  { %590 = vmatpush3.bf16.msra.mxu0 %v631_v42 }
  0x58   :  { %591 = vmatprep.subr.bf16.mxu0 %v632_v43 }
  0x5b   :  { %592 = vmatpush3.bf16.msra.mxu0 %v632_v43 }
 0x111   :  { %v555_v27 = vpop.f32.mrb[0].mxu0 }
 0x112   :  { %v192_v28 = vadd.f32 %v555_v27, %v478_v26  ;;  %v183_v29 = vpop.f32.mrb[1].mxu0 }
 0x113   :  { %v184_v30 = vadd.f32 %v478_v26, %v183_v29  ;;  %v556_v31 = vpop.f32.mrb[2].mxu0 }
 0x114   :  { %v195_v32 = vadd.f32 %v556_v31, %v478_v26  ;;  %v186_v33 = vpop.f32.mrb[3].mxu0  ;;  %v200_v35 = vmax.f32 %v192_v28, 0.0 }
 0x115   :  { %v187_v34 = vadd.f32 %v478_v26, %v186_v33  ;;  %v198_v37 = vmax.f32 %v184_v30, 0.0 }
 0x116   :  { %v201_v36 = vmax.f32 %v195_v32, 0.0 }
 0x117   :  { %v199_v38 = vmax.f32 %v187_v34, 0.0 }
 0x118   :  { %v203_v39 = vpack.c.bf16 %v201_v36, %v200_v35 }
 0x119   :  { %v202_v40 = vpack.c.bf16 %v199_v38, %v198_v37 }
 0x11b   :  { %573 = vmatprep.mubr.bf16.mxu1 %v202_v40 }
 0x11c   :  { %574 = vmatmul.mubr.bf16.vlgmr.msra.gmra.mrb[0].mxu1 %v203_v39 }
 0x1ef   :  { %v575_v46 = vpop.f32.mrb[0].mxu1 }
 0x1f0   :  { %v323_v49 = vadd.f32 %v575_v46, %v206_v44  ;;  %v306_v50 = vpop.f32.mrb[1].mxu1 }
 0x1f1   :  { %v321_v52 = vadd.f32 %v306_v50, %v204_v45  ;;  %v576_v53 = vpop.f32.mrb[2].mxu1 }
 0x1f2   :  { %v334_v54 = vadd.f32 %v497_v47, %v323_v49  ;;  %v324_v55 = vadd.f32 %v576_v53, %v207_v48  ;;  %v309_v56 = vpop.f32.mrb[3].mxu1 }
 0x1f3   :  { %v332_v57 = vadd.f32 %v497_v47, %v321_v52  ;;  %v322_v58 = vadd.f32 %v309_v56, %v205_v51 }
 0x1f4   :  { %v335_v59 = vadd.f32 %v497_v47, %v324_v55  ;;  %v338_v61 = vmax.f32 %v334_v54, 0.0 }
 0x1f5   :  { %v333_v60 = vadd.f32 %v497_v47, %v322_v58  ;;  %v336_v63 = vmax.f32 %v332_v57, 0.0 }
 0x1f6   :  { %v339_v62 = vmax.f32 %v335_v59, 0.0 }
 0x1f7   :  { %v337_v0 = vmax.f32 %v333_v60, 0.0 }
 0x1f8   :  { %v341_v1 = vpack.c.bf16 %v339_v62, %v338_v61 }
 0x1f9   :  { %v340_v2 = vpack.c.bf16 %v337_v0, %v336_v63 }
 0x1fb   :  { %593 = vmatprep.mubr.bf16.mxu0 %v340_v2 }
 0x1fc   :  { %594 = vmatmul.mubr.bf16.vlgmr.msra.gmra.mrb[4].mxu0 %v341_v1 }
 0x2cf   :  { %v595_v4 = vpop.f32.mrb[4].mxu0 }
 0x2d0   :  { %v456_v5 = vadd.f32 %v595_v4, %v498_v3  ;;  %v447_v6 = vpop.f32.mrb[5].mxu0 }
 0x2d1   :  { %v448_v7 = vadd.f32 %v498_v3, %v447_v6  ;;  %v596_v8 = vpop.f32.mrb[6].mxu0 }
 0x2d2   :  { %464 = vst [vmem:[%s850_s11 + $0x10] sm:$0xff] %v456_v5  ;;  %v459_v9 = vadd.f32 %v596_v8, %v498_v3  ;;  %v450_v10 = vpop.f32.mrb[7].mxu0 }
 0x2d3   :  { %462 = vst [vmem:[%s850_s11] sm:$0xff] %v448_v7  ;;  %v451_v11 = vadd.f32 %v498_v3, %v450_v10 }
 0x2d4   :  { %465 = vst [vmem:[%s850_s11 + $0x18] sm:$0xff] %v459_v9 }
 0x2d5   :  { %463 = vst [vmem:[%s850_s11 + $0x8] sm:$0xff] %v451_v11 }

// kernel: parametric_gcn_forward.2
= control target key start
LH: loop header
LB: loop body
LE: loop exit
PB: predicated region body
PF: predicated region fallthrough
CT: control target
= control target key end

     0   :  { %v806_v0 = vmov 0.0   ;;  %vm807_vm0 = vmmov 0   ;;  %vm154_vm1 = vcmask 130048   ;;  %s1020_s2 = inlined_call_operand.vmem [shape: bf16[2,128,128], index: 2, kind: input, shape index: {}]   ;;  %s1021_s1 = inlined_call_operand.vmem [shape: bf16[16,128], index: 1, kind: input, shape index: {}]   ;;  %s1022_s0 = inlined_call_operand.vmem [shape: bf16[16,16], index: 0, kind: input, shape index: {}]   ;;  %s1023_s3 = inlined_call_operand.vmem [shape: f32[2,1,128], index: 3, kind: input, shape index: {}]   ;;  %s1024_s4 = inlined_call_operand.vmem [shape: bf16[128,128], index: 4, kind: input, shape index: {}]   ;;  %s1025_s5 = inlined_call_operand.vmem [shape: bf16[128,128], index: 5, kind: input, shape index: {}]   ;;  %s1026_s6 = inlined_call_operand.vmem [shape: f32[16,128], index: 6, kind: output, shape index: {0}]   ;;  %s1027_s7 = inlined_call_operand.vmem [shape: f32[16,128], index: 7, kind: output, shape index: {1}]  }
   0x1   :  { %678 = vmatprep.subr.bf16.mxu0 %v806_v0  ;;  %v772_v1 = vld [vmem:[%s1020_s2] sm:$0xff]   ;;  %694 = vmatprep.mubr.msk.bf16.mxu0 %vm807_vm0, %v806_v0  ;;  %v773_v2 = vld [vmem:[%s1020_s2 + $0x8] sm:$0xff]   ;;  %v774_v3 = vld [vmem:[%s1020_s2 + $0x10] sm:$0xff]  }
   0x2   :  { %698 = vmatprep.subr.bf16.mxu1 %v806_v0  ;;  %700 = vmatprep.mubr.msk.bf16.mxu1 %vm807_vm0, %v806_v0  ;;  %v775_v4 = vld [vmem:[%s1020_s2 + $0x18] sm:$0xff]   ;;  %v776_v5 = vld [vmem:[%s1020_s2 + $0x20] sm:$0xff]   ;;  %v777_v6 = vld [vmem:[%s1020_s2 + $0x28] sm:$0xff]  }
   0x3   :  { %679 = vmatpush3.bf16.msra.mxu0 %v772_v1  ;;  %v778_v7 = vld [vmem:[%s1020_s2 + $0x30] sm:$0xff]   ;;  %v779_v8 = vld [vmem:[%s1020_s2 + $0x38] sm:$0xff]   ;;  %v780_v9 = vld [vmem:[%s1021_s1] sm:$0xff]  }
   0x4   :  { %680 = vmatprep.subr.bf16.mxu0 %v806_v0  ;;  %v894_v15 = vld [vmem:[%s1022_s0] sm:$0xff]   ;;  %v783_v17 = vld [vmem:[%s1020_s2 + $0x48] sm:$0xff]   ;;  %v784_v18 = vld [vmem:[%s1020_s2 + $0x50] sm:$0xff]  }
   0x5   :  { %v782_v16 = vld [vmem:[%s1020_s2 + $0x40] sm:$0xff]   ;;  %v785_v19 = vld [vmem:[%s1020_s2 + $0x58] sm:$0xff]   ;;  %v787_v21 = vld [vmem:[%s1020_s2 + $0x68] sm:$0xff]  }
   0x6   :  { %v786_v20 = vld [vmem:[%s1020_s2 + $0x60] sm:$0xff]   ;;  %v788_v22 = vld [vmem:[%s1020_s2 + $0x70] sm:$0xff]   ;;  %v789_v23 = vld [vmem:[%s1020_s2 + $0x78] sm:$0xff]  }
   0x7   :  { %681 = vmatpush3.bf16.msra.mxu0 %v773_v2  ;;  %v592_v24 = vld [vmem:[%s1023_s3] ss:$0 sm:$0xff]  ;;  %v792_v35 = vld [vmem:[%s1024_s4 + $0x8] sm:$0xff]   ;;  %v794_v36 = vld [vmem:[%s1024_s4 + $0x10] sm:$0xff]  }
   0x8   :  { %682 = vmatprep.subr.bf16.mxu0 %v806_v0  ;;  %v790_v34 = vld [vmem:[%s1024_s4] sm:$0xff]   ;;  %v796_v37 = vld [vmem:[%s1024_s4 + $0x18] sm:$0xff]   ;;  %v800_v39 = vld [vmem:[%s1024_s4 + $0x28] sm:$0xff]  }
   0x9   :  { %v798_v38 = vld [vmem:[%s1024_s4 + $0x20] sm:$0xff]   ;;  %v793_v46 = vld [vmem:[%s1025_s5 + $0x8] sm:$0xff]   ;;  %v795_v47 = vld [vmem:[%s1025_s5 + $0x10] sm:$0xff]  }
   0xa   :  { %v791_v45 = vld [vmem:[%s1025_s5] sm:$0xff]   ;;  %v797_v48 = vld [vmem:[%s1025_s5 + $0x18] sm:$0xff]   ;;  %v801_v50 = vld [vmem:[%s1025_s5 + $0x28] sm:$0xff]  }
   0xb   :  { %683 = vmatpush3.bf16.msra.mxu0 %v774_v3  ;;  %v799_v49 = vld [vmem:[%s1025_s5 + $0x20] sm:$0xff]   ;;  %v802_v51 = vld [vmem:[%s1024_s4 + $0x30] sm:$0xff]   ;;  %v804_v53 = vld [vmem:[%s1024_s4 + $0x38] sm:$0xff]  }
   0xc   :  { %684 = vmatprep.subr.bf16.mxu0 %v806_v0  ;;  %v803_v52 = vld [vmem:[%s1025_s5 + $0x30] sm:$0xff]   ;;  %v805_v54 = vld [vmem:[%s1025_s5 + $0x38] sm:$0xff]   ;;  %v620_v55 = vld [vmem:[%s1023_s3 + $0x1] ss:$0 sm:$0xff] }
   0xf   :  { %685 = vmatpush3.bf16.msra.mxu0 %v775_v4 }
  0x10   :  { %686 = vmatprep.subr.bf16.mxu0 %v806_v0 }
  0x13   :  { %687 = vmatpush3.bf16.msra.mxu0 %v776_v5 }
  0x14   :  { %688 = vmatprep.subr.bf16.mxu0 %v806_v0 }
  0x17   :  { %689 = vmatpush3.bf16.msra.mxu0 %v777_v6 }
  0x18   :  { %690 = vmatprep.subr.bf16.mxu0 %v806_v0 }
  0x1b   :  { %691 = vmatpush3.bf16.msra.mxu0 %v778_v7 }
  0x1c   :  { %692 = vmatprep.subr.bf16.mxu0 %v806_v0 }
  0x1f   :  { %693 = vmatpush3.bf16.msra.mxu0 %v779_v8 }
  0x20   :  { %724 = vmatprep.subr.bf16.mxu0 %v806_v0 }
  0x22   :  { %695 = vmatmul.mubr.bf16.vlgmr.msra.gmra.mrb[0].mxu0 %v780_v9 }
  0x23   :  { %726 = vmatprep.mubr.msk.bf16.mxu0 %vm807_vm0, %v806_v0 }
  0xf5   :  { %v134_v10 = vpop.f32.mrb[0].mxu0 }
  0xf6   :  { %v696_v11 = vpop.f32.mrb[1].mxu0 }
  0xf7   :  { %v137_v12 = vpop.f32.mrb[2].mxu0 }
  0xf8   :  { %v141_v13 = vpack.c.bf16 %v137_v12, %v134_v10  ;;  %v697_v14 = vpop.f32.mrb[3].mxu0 }
  0xfa   :  { %699 = vmatpush3.bf16.msra.mxu1 %v141_v13 }
  0xfb   :  { %704 = vmatprep.subr.bf16.mxu1 %v806_v0 }
  0xfd   :  { %701 = vmatmul.mubr.msk.bf16.vlgmr.msra.gmra.mrb[0].mxu1 %vm154_vm1, %v894_v15 }
  0xfe   :  { %705 = vmatpush3.bf16.msra.mxu1 %v782_v16  ;;  %720 = vmatprep.mubr.msk.bf16.mxu1 %vm807_vm0, %v806_v0 }
  0xff   :  { %706 = vmatprep.subr.bf16.mxu1 %v806_v0 }
 0x102   :  { %707 = vmatpush3.bf16.msra.mxu1 %v783_v17 }
 0x103   :  { %708 = vmatprep.subr.bf16.mxu1 %v806_v0 }
 0x106   :  { %709 = vmatpush3.bf16.msra.mxu1 %v784_v18 }
 0x107   :  { %710 = vmatprep.subr.bf16.mxu1 %v806_v0 }
 0x10a   :  { %711 = vmatpush3.bf16.msra.mxu1 %v785_v19 }
 0x10b   :  { %712 = vmatprep.subr.bf16.mxu1 %v806_v0 }
 0x10e   :  { %713 = vmatpush3.bf16.msra.mxu1 %v786_v20 }
 0x10f   :  { %714 = vmatprep.subr.bf16.mxu1 %v806_v0 }
 0x112   :  { %715 = vmatpush3.bf16.msra.mxu1 %v787_v21 }
 0x113   :  { %716 = vmatprep.subr.bf16.mxu1 %v806_v0 }
 0x116   :  { %717 = vmatpush3.bf16.msra.mxu1 %v788_v22 }
 0x117   :  { %718 = vmatprep.subr.bf16.mxu1 %v806_v0 }
 0x11a   :  { %719 = vmatpush3.bf16.msra.mxu1 %v789_v23 }
 0x11b   :  { %730 = vmatprep.subr.bf16.mxu1 %v806_v0 }
 0x1d0   :  { %v192_v25 = vpop.f32.mrb[0].mxu1 }
 0x1d1   :  { %v193_v26 = vadd.f32 %v592_v24, %v192_v25  ;;  %v702_v27 = vpop.f32.mrb[1].mxu1 }
 0x1d2   :  { %v195_v28 = vpop.f32.mrb[2].mxu1 }
 0x1d3   :  { %v196_v29 = vadd.f32 %v592_v24, %v195_v28  ;;  %v703_v30 = vpop.f32.mrb[3].mxu1  ;;  %v199_v31 = vmax.f32 %v193_v26, 0.0 }
 0x1d5   :  { %v200_v32 = vmax.f32 %v196_v29, 0.0 }
 0x1d7   :  { %v201_v33 = vpack.c.bf16 %v200_v32, %v199_v31 }
 0x1d9   :  { %721 = vmatmul.mubr.bf16.vlgmr.msra.gmra.mrb[4].mxu1 %v201_v33 }
 0x1da   :  { %746 = vmatprep.mubr.msk.bf16.mxu1 %vm807_vm0, %v806_v0  ;;  %731 = vmatpush3.bf16.msra.mxu1 %v790_v34 }
 0x1db   :  { %732 = vmatprep.subr.bf16.mxu1 %v806_v0 }
 0x1de   :  { %733 = vmatpush3.bf16.msra.mxu1 %v792_v35 }
 0x1df   :  { %734 = vmatprep.subr.bf16.mxu1 %v806_v0 }
 0x1e2   :  { %735 = vmatpush3.bf16.msra.mxu1 %v794_v36 }
 0x1e3   :  { %736 = vmatprep.subr.bf16.mxu1 %v806_v0 }
 0x1e6   :  { %737 = vmatpush3.bf16.msra.mxu1 %v796_v37 }
 0x1e7   :  { %738 = vmatprep.subr.bf16.mxu1 %v806_v0 }
 0x1ea   :  { %739 = vmatpush3.bf16.msra.mxu1 %v798_v38 }
 0x1eb   :  { %740 = vmatprep.subr.bf16.mxu1 %v806_v0 }
 0x1ee   :  { %741 = vmatpush3.bf16.msra.mxu1 %v800_v39 }
 0x1ef   :  { %742 = vmatprep.subr.bf16.mxu1 %v806_v0 }
 0x1f2   :  { %743 = vmatpush3.bf16.msra.mxu1 %v802_v51 }
 0x1f3   :  { %744 = vmatprep.subr.bf16.mxu1 %v806_v0 }
 0x1f6   :  { %745 = vmatpush3.bf16.msra.mxu1 %v804_v53 }
 0x2ac   :  { %v301_v40 = vpop.f32.mrb[4].mxu1 }
 0x2ad   :  { %v722_v41 = vpop.f32.mrb[5].mxu1 }
 0x2ae   :  { %v304_v42 = vpop.f32.mrb[6].mxu1 }
 0x2af   :  { %v308_v43 = vpack.c.bf16 %v304_v42, %v301_v40  ;;  %v723_v44 = vpop.f32.mrb[7].mxu1 }
 0x2b1   :  { %725 = vmatpush3.bf16.msra.mxu0 %v308_v43 }
 0x2b2   :  { %750 = vmatprep.subr.bf16.mxu0 %v806_v0 }
 0x2b4   :  { %727 = vmatmul.mubr.msk.bf16.vlgmr.msra.gmra.mrb[4].mxu0 %vm154_vm1, %v894_v15 }
 0x2b5   :  { %751 = vmatpush3.bf16.msra.mxu0 %v791_v45  ;;  %766 = vmatprep.mubr.msk.bf16.mxu0 %vm807_vm0, %v806_v0 }
 0x2b6   :  { %752 = vmatprep.subr.bf16.mxu0 %v806_v0 }
 0x2b9   :  { %753 = vmatpush3.bf16.msra.mxu0 %v793_v46 }
 0x2ba   :  { %754 = vmatprep.subr.bf16.mxu0 %v806_v0 }
 0x2bd   :  { %755 = vmatpush3.bf16.msra.mxu0 %v795_v47 }
 0x2be   :  { %756 = vmatprep.subr.bf16.mxu0 %v806_v0 }
 0x2c1   :  { %757 = vmatpush3.bf16.msra.mxu0 %v797_v48 }
 0x2c2   :  { %758 = vmatprep.subr.bf16.mxu0 %v806_v0 }
 0x2c5   :  { %759 = vmatpush3.bf16.msra.mxu0 %v799_v49 }
 0x2c6   :  { %760 = vmatprep.subr.bf16.mxu0 %v806_v0 }
 0x2c9   :  { %761 = vmatpush3.bf16.msra.mxu0 %v801_v50 }
 0x2ca   :  { %762 = vmatprep.subr.bf16.mxu0 %v806_v0 }
 0x2cd   :  { %763 = vmatpush3.bf16.msra.mxu0 %v803_v52 }
 0x2ce   :  { %764 = vmatprep.subr.bf16.mxu0 %v806_v0 }
 0x2d1   :  { %765 = vmatpush3.bf16.msra.mxu0 %v805_v54 }
 0x387   :  { %v351_v56 = vpop.f32.mrb[4].mxu0 }
 0x388   :  { %v352_v57 = vadd.f32 %v620_v55, %v351_v56  ;;  %v728_v58 = vpop.f32.mrb[5].mxu0 }
 0x389   :  { %v354_v59 = vpop.f32.mrb[6].mxu0 }
 0x38a   :  { %v355_v60 = vadd.f32 %v620_v55, %v354_v59  ;;  %v729_v61 = vpop.f32.mrb[7].mxu0  ;;  %v358_v62 = vmax.f32 %v352_v57, 0.0 }
 0x38c   :  { %v359_v63 = vmax.f32 %v355_v60, 0.0 }
 0x38e   :  { %v360_v0 = vpack.c.bf16 %v359_v63, %v358_v62 }
 0x390   :  { %747 = vmatmul.mubr.bf16.vlgmr.msra.gmra.mrb[8].mxu1 %v360_v0  ;;  %767 = vmatmul.mubr.bf16.vlgmr.msra.gmra.mrb[8].mxu0 %v360_v0 }
 0x463   :  { %v459_v1 = vpop.f32.mrb[8].mxu1  ;;  %v566_v2 = vpop.f32.mrb[8].mxu0 }
 0x464   :  { %466 = vst [vmem:[%s1026_s6] sm:$0xff] %v459_v1  ;;  %573 = vst [vmem:[%s1027_s7] sm:$0xff] %v566_v2  ;;  %v748_v3 = vpop.f32.mrb[9].mxu1  ;;  %v768_v4 = vpop.f32.mrb[9].mxu0 }
 0x465   :  { %v462_v5 = vpop.f32.mrb[10].mxu1  ;;  %v569_v6 = vpop.f32.mrb[10].mxu0 }
 0x466   :  { %467 = vst [vmem:[%s1026_s6 + $0x8] sm:$0xff] %v462_v5  ;;  %574 = vst [vmem:[%s1027_s7 + $0x8] sm:$0xff] %v569_v6  ;;  %v749_v7 = vpop.f32.mrb[11].mxu1  ;;  %v769_v8 = vpop.f32.mrb[11].mxu0 }

</bundles_post_ra>
